<compile_context>
chip_gen: v7x
topology: tpu7x:2x2x1
jax: 0.10.0
libtpu: 0.0.40
codegen_flags: <defaults>
</compile_context>

<pallas_src>
import functools

import jax
import jax.numpy as jnp
from jax import lax
from jax.experimental import pallas as pl
from jax.experimental.pallas import tpu as pltpu


def _round_up(x, m):
    return ((x + m - 1) // m) * m


def _cdiv(a, b):
    return -(-a // b)


def _vmem_budget_bytes():
    """Generation-aware VMEM budget (headroom below physical capacity)."""
    try:
        cap = pltpu.get_tpu_info().vmem_capacity_bytes
    except Exception:
        cap = 128 * 1024 * 1024
    if cap <= 64 * 1024 * 1024:
        # v7x-class: 64 MiB per TensorCore -> stay well under to avoid spills.
        return 44 * 1024 * 1024
    # v5e / v6e-class: 128 MiB physical.
    return 96 * 1024 * 1024


# --------------------------------------------------------------------------
# Kernels
# --------------------------------------------------------------------------
def _linear_resident_kernel(x_ref, w_ref, b_ref, o_ref):
    """Weight-resident mode: full (K, C) weight stays in VMEM; grid over M only."""
    acc = jnp.dot(x_ref[...], w_ref[...], preferred_element_type=jnp.float32)
    o_ref[...] = (acc + b_ref[...].astype(jnp.float32)).astype(o_ref.dtype)


def _linear_tiled_kernel(x_ref, w_ref, b_ref, o_ref, acc_ref):
    """General K-tiled mode (weights too large to hold resident in VMEM)."""
    k = pl.program_id(2)
    part = jnp.dot(x_ref[...], w_ref[...], preferred_element_type=jnp.float32)

    @pl.when(k == 0)
    def _():
        acc_ref[...] = part  # seed accumulator: no zero-fill store

    @pl.when(k != 0)
    def _():
        acc_ref[...] = acc_ref[...] + part

    @pl.when(k == pl.num_programs(2) - 1)
    def _():
        # Bias added once, in f32, only in the finalize step.
        o_ref[...] = (acc_ref[...] + b_ref[...].astype(jnp.float32)).astype(
            o_ref.dtype
        )


# --------------------------------------------------------------------------
# Wrappers
# --------------------------------------------------------------------------
def make_linear_params(w, b, compute_dtype=jnp.bfloat16):
    """Pad + cast parameters ONCE (module init), not per forward."""
    k_dim, c_dim = w.shape
    k_pad = _round_up(k_dim, 128)
    c_pad = _round_up(c_dim, 128)
    wp = jnp.pad(w, ((0, k_pad - k_dim), (0, c_pad - c_dim))).astype(compute_dtype)
    bp = jnp.pad(b.reshape(1, -1), ((0, 0), (0, c_pad - c_dim))).astype(jnp.float32)
    return wp, bp


def linear_pallas(x2d, wp, bp, *, out_dtype=None):
    """y = x2d @ W + b.  x2d: [N, K]; wp: pre-padded bf16 [k_pad, c_pad];
    bp: pre-padded f32 [1, c_pad].  Returns [N, c_pad] (caller slices cols)."""
    n_rows, k_dim = x2d.shape
    k_pad, c_pad = wp.shape
    assert k_dim <= k_pad
    compute_dtype = wp.dtype
    out_dtype = out_dtype if out_dtype is not None else x2d.dtype

    cd_bytes = jnp.dtype(compute_dtype).itemsize
    out_bytes = jnp.dtype(out_dtype).itemsize
    budget = _vmem_budget_bytes()

    n_pad0 = _round_up(max(n_rows, 8), 8)

    # ---------------- weight-resident mode ----------------
    # W block index is constant across the grid -> DMA'd from HBM once and
    # kept resident (pipeline still allocates 2 buffers; budget accounts it).
    w_vmem = 2 * k_pad * c_pad * cd_bytes
    if w_vmem <= budget // 2:
        per_row = 2 * k_pad * cd_bytes + 2 * c_pad * out_bytes
        tm_max = max(8, ((budget - w_vmem) // per_row) // 8 * 8)
        tm = min(512, tm_max, n_pad0)
        # v7x has 2 TensorCores: prefer >=2 blocks along the parallel M axis.
        if n_pad0 > 8 and _cdiv(n_pad0, tm) < 2:
            tm = max(8, _round_up(_cdiv(n_pad0, 2), 8))
        n_pad = _round_up(n_pad0, tm)

        xp = jnp.pad(
            x2d, ((0, n_pad - n_rows), (0, k_pad - k_dim))
        ).astype(compute_dtype)

        flops = 2 * n_pad * c_pad * k_pad
        bytes_accessed = (
            xp.size * cd_bytes          # activations, read once
            + wp.size * cd_bytes        # weights, read once (resident)
            + bp.size * 4
            + n_pad * c_pad * out_bytes
        )

        out = pl.pallas_call(
            _linear_resident_kernel,
            out_shape=jax.ShapeDtypeStruct((n_pad, c_pad), out_dtype),
            grid_spec=pltpu.PrefetchScalarGridSpec(
                num_scalar_prefetch=0,
                grid=(n_pad // tm,),
                in_specs=[
                    pl.BlockSpec((tm, k_pad), lambda i: (i, 0)),
                    pl.BlockSpec((k_pad, c_pad), lambda i: (0, 0)),  # resident W
                    pl.BlockSpec((1, c_pad), lambda i: (0, 0)),
                ],
                out_specs=pl.BlockSpec((tm, c_pad), lambda i: (i, 0)),
            ),
            compiler_params=pltpu.CompilerParams(
                dimension_semantics=("parallel",),
                vmem_limit_bytes=budget,
            ),
            cost_estimate=pl.CostEstimate(
                flops=flops, transcendentals=0, bytes_accessed=bytes_accessed
            ),
        )(xp, wp, bp)
        return out[:n_rows, :]

    # ---------------- tiled fallback (very large weights) ----------------
    tm = min(512, n_pad0)
    tn = min(512, c_pad)
    tk = min(512, k_pad)

    def footprint(tm_, tn_, tk_):
        return (
            2 * tm_ * tk_ * cd_bytes      # double-buffered A tiles
            + 2 * tk_ * tn_ * cd_bytes    # double-buffered W tiles
            + tm_ * tn_ * 4               # f32 accumulator
            + 2 * tm_ * tn_ * out_bytes   # double-buffered output tiles
            + 2 * tn_ * 4                 # bias
        )

    while footprint(tm, tn, tk) > budget and (tk > 128 or tn > 128):
        if tk > 128:
            tk //= 2
        else:
            tn //= 2

    # Re-pad so tiles divide evenly (no-op for the common power-of-two H).
    n_pad = _round_up(n_pad0, tm)
    k_full = _round_up(k_pad, tk)
    c_full = _round_up(c_pad, tn)
    xp = jnp.pad(x2d, ((0, n_pad - n_rows), (0, k_full - k_dim))).astype(compute_dtype)
    wp_f = jnp.pad(wp, ((0, k_full - k_pad), (0, c_full - c_pad)))
    bp_f = jnp.pad(bp, ((0, 0), (0, c_full - c_pad)))

    grid = (n_pad // tm, c_full // tn, k_full // tk)
    flops = 2 * n_pad * c_full * k_full
    bytes_accessed = (
        xp.size * cd_bytes * (c_full // tn)     # A re-streamed per N tile
        + wp_f.size * cd_bytes * (n_pad // tm)  # W re-streamed per M tile
        + bp_f.size * 4
        + n_pad * c_full * out_bytes
    )

    out = pl.pallas_call(
        _linear_tiled_kernel,
        out_shape=jax.ShapeDtypeStruct((n_pad, c_full), out_dtype),
        grid_spec=pltpu.PrefetchScalarGridSpec(
            num_scalar_prefetch=0,
            grid=grid,
            in_specs=[
                pl.BlockSpec((tm, tk), lambda i, j, k: (i, k)),
                pl.BlockSpec((tk, tn), lambda i, j, k: (k, j)),
                pl.BlockSpec((1, tn), lambda i, j, k: (0, j)),
            ],
            out_specs=pl.BlockSpec((tm, tn), lambda i, j, k: (i, j)),
            scratch_shapes=[pltpu.VMEM((tm, tn), jnp.float32)],
        ),
        compiler_params=pltpu.CompilerParams(
            dimension_semantics=("parallel", "parallel", "arbitrary"),
            vmem_limit_bytes=budget,
        ),
        cost_estimate=pl.CostEstimate(
            flops=flops, transcendentals=0, bytes_accessed=bytes_accessed
        ),
    )(xp, wp_f, bp_f)
    return out[:n_rows, :c_pad]


def inner_module(x, wp, bp, c_dim, *, use_pallas=None):
    """The wrapped `module`: Linear(H -> c_dim) applied over the last dim."""
    B, S, H = x.shape
    x2d = x.reshape(B * S, H)
    if use_pallas is None:
        # Tiny-shape fast path: below ~1 MFLOP, pad/cast + grid overhead of a
        # custom kernel dominates -> a fused XLA dot is strictly faster.
        use_pallas = (2 * B * S * H * c_dim) >= 1_000_000
    if use_pallas:
        y2d = linear_pallas(x2d, wp, bp, out_dtype=x.dtype)[:, :c_dim]
    else:
        y2d = (
            jnp.dot(x2d.astype(wp.dtype), wp[:H, :c_dim],
                    preferred_element_type=jnp.float32)
            + bp[0, :c_dim]
        ).astype(x.dtype)
    return y2d.reshape(B, S, c_dim)


@functools.partial(
    jax.jit,
    static_argnames=("survival_prob", "training", "c_dim", "use_pallas"),
)
def stochastic_depth_forward(x, wp, bp, rng_key, *, survival_prob, training,
                             c_dim, use_pallas=None):
    """Reproduces StochasticDepth.forward semantics for tensor inputs."""
    if (not training) or survival_prob == 1.0:
        return inner_module(x, wp, bp, c_dim, use_pallas=use_pallas)
    # One scalar draw per forward pass (torch.rand(1).item() < survival_prob).
    keep = jax.random.uniform(rng_key, ()) < survival_prob
    # TODO(synk): reference applies NO 1/survival_prob rescaling on the kept
    # branch; preserved as-is to match text2motion semantics.
    return lax.cond(
        keep,
        lambda t: inner_module(t, wp, bp, c_dim, use_pallas=use_pallas),
        lambda t: t,
        x,
    )


if __name__ == "__main__":
    B, S, H = 2, 8, 32  # batch, seq, hidden

    key = jax.random.PRNGKey(0)
    kx, kw, kb, kgate = jax.random.split(key, 4)

    x = jax.random.normal(kx, (B, S, H), dtype=jnp.float32)
    # Deterministic parameter init (nn.Linear-like scale).
    bound = 1.0 / (H ** 0.5)
    w = jax.random.uniform(kw, (H, H), minval=-bound, maxval=bound, dtype=jnp.float32)
    b = jax.random.uniform(kb, (H,), minval=-bound, maxval=bound, dtype=jnp.float32)

    # Weight pad/cast hoisted out of the forward (done once, like module init).
    wp, bp = make_linear_params(w, b)
    jax.block_until_ready((wp, bp))

    # Eval path (always runs the wrapped module); force the Pallas path so the
    # kernel is exercised even at this toy shape.
    y_eval = stochastic_depth_forward(
        x, wp, bp, kgate, survival_prob=0.8, training=False, c_dim=H,
        use_pallas=True,
    )
    jax.block_until_ready(y_eval)

    # Training path with stochastic gate.
    y_train = stochastic_depth_forward(
        x, wp, bp, kgate, survival_prob=0.8, training=True, c_dim=H,
        use_pallas=True,
    )
    jax.block_until_ready(y_train)

    # Sanity: eval output matches a pure-JAX reference of the inner module
    # (reference uses the same bf16-quantized operands, f32 accumulation).
    x_q = x.astype(jnp.bfloat16).astype(jnp.float32)
    w_q = w.astype(jnp.bfloat16).astype(jnp.float32)
    y_ref = x_q.reshape(B * S, H) @ w_q + b
    assert jnp.allclose(
        y_eval.reshape(B * S, H), y_ref, atol=1e-4, rtol=1e-4
    ), "mismatch vs reference"

    # Training output is either the module output or the input, exactly.
    y_train2d = y_train.reshape(B * S, H)
    assert jnp.allclose(y_train2d, y_ref, atol=1e-4, rtol=1e-4) or jnp.allclose(
        y_train2d, x.reshape(B * S, H), atol=1e-6
    ), "training output is neither module(x) nor x"

    print("KERNEL_OK")
</pallas_src>

<mosaic_0001>
module attributes {stable_mosaic.version = 11 : i64} {
  func.func @_linear_resident_kernel(%arg0: i32, %arg1: memref<8x128xbf16, #tpu.memory_space<vmem>>, %arg2: memref<128x128xbf16, #tpu.memory_space<vmem>>, %arg3: memref<1x128xf32, #tpu.memory_space<vmem>>, %arg4: memref<8x128xf32, #tpu.memory_space<vmem>>) attributes {dimension_semantics = [#tpu.dimension_semantics<parallel>], iteration_bounds = array<i64: 2>, scalar_prefetch = 0 : i64, scratch_operands = 0 : i64, tpu.core_type = #tpu.core_type<tc>, window_params = [{transform_indices = @transform_0, window_bounds = array<i64: 8, 128>}, {pipeline_mode = #tpu.pipeline_mode<synchronous>, transform_indices = @transform_1, window_bounds = array<i64: 128, 128>}, {pipeline_mode = #tpu.pipeline_mode<synchronous>, transform_indices = @transform_2, window_bounds = array<i64: 1, 128>}, {transform_indices = @transform_3, window_bounds = array<i64: 8, 128>}]} {
    %c0 = arith.constant 0 : index
    %c0_0 = arith.constant 0 : index
    %0 = vector.load %arg1[%c0, %c0_0] : memref<8x128xbf16, #tpu.memory_space<vmem>>, vector<8x128xbf16>
    %c0_1 = arith.constant 0 : index
    %c0_2 = arith.constant 0 : index
    %1 = vector.load %arg2[%c0_1, %c0_2] : memref<128x128xbf16, #tpu.memory_space<vmem>>, vector<128x128xbf16>
    %cst = arith.constant dense<0.000000e+00> : vector<8x128xf32>
    %2 = tpu.matmul %0, %1, %cst {dimension_numbers = #tpu.dot_dimension_numbers<[1], [0], [0], [1], [0, 0, 1, 1], [], []>} : vector<8x128xbf16>, vector<128x128xbf16>, vector<8x128xf32> -> vector<8x128xf32>
    %c0_3 = arith.constant 0 : index
    %c0_4 = arith.constant 0 : index
    %3 = vector.load %arg3[%c0_3, %c0_4] : memref<1x128xf32, #tpu.memory_space<vmem>>, vector<1x128xf32>
    %4 = vector.broadcast %3 : vector<1x128xf32> to vector<8x128xf32>
    %5 = arith.addf %2, %4 : vector<8x128xf32>
    %c0_5 = arith.constant 0 : index
    %c0_6 = arith.constant 0 : index
    %6 = vector.load %arg4[%c0_5, %c0_6] : memref<8x128xf32, #tpu.memory_space<vmem>>, vector<8x128xf32>
    tpu.vector_store %arg4[%c0_5, %c0_6], %5 {strides = array<i32>} : memref<8x128xf32, #tpu.memory_space<vmem>>, vector<8x128xf32>,
    return
  }
  func.func @transform_0(%arg0: i32) -> (i32, i32) {
    %c0_i32 = arith.constant 0 : i32
    %c0_i32_0 = arith.constant 0 : i32
    return %arg0, %c0_i32 : i32, i32
  }
  func.func @transform_1(%arg0: i32) -> (i32, i32) {
    %c0_i32 = arith.constant 0 : i32
    %c0_i32_0 = arith.constant 0 : i32
    %c0_i32_1 = arith.constant 0 : i32
    return %c0_i32, %c0_i32_0 : i32, i32
  }
  func.func @transform_2(%arg0: i32) -> (i32, i32) {
    %c0_i32 = arith.constant 0 : i32
    %c0_i32_0 = arith.constant 0 : i32
    %c0_i32_1 = arith.constant 0 : i32
    return %c0_i32, %c0_i32_0 : i32, i32
  }
  func.func @transform_3(%arg0: i32) -> (i32, i32) {
    %c0_i32 = arith.constant 0 : i32
    %c0_i32_0 = arith.constant 0 : i32
    return %arg0, %c0_i32 : i32, i32
  }
}

</mosaic_0001>

<bundles_post_ra>
// kernel: stochastic_depth_forward.1
= control target key start
LH: loop header
LB: loop body
LE: loop exit
PB: predicated region body
PF: predicated region fallthrough
CT: control target
= control target key end

     0   :  { %8 = vsyncpa [#allocation3], 0  ;;  %s983_s0 = inlined_call_operand.hbm [shape: bf16[16,128], index: 0, kind: input, shape index: {}]   ;;  %s984_s1 = inlined_call_operand.hbm [shape: bf16[128,128], index: 1, kind: input, shape index: {}]   ;;  %s985_s2 = inlined_call_operand.hbm [shape: f32[1,128], index: 2, kind: input, shape index: {}]   ;;  %s986_s3 = inlined_call_operand.hbm [shape: f32[16,128], index: 3, kind: output, shape index: {}]  }
   0x1   :  { %10 = vsyncpa [#allocation3 + $0x1], 0 }
   0x2   :  { %11 = vsyncpa [#allocation6], 0 }
   0x3   :  { %12 = vsyncpa [#allocation4], 0 }
   0x4   :  { %14 = vsyncpa [#allocation4 + $0x1], 0  ;;  %s749_s12 = smov 0   ;;  %s751_s13 = smov 0  }
   0x5   :  { %s753_s14 = smov 0   ;;  %s755_s15 = smov 0  }
   0x6 LB: > { %s770_s16 = sadd.s32 4294967295, %s719_s15   ;;  %s430_s17 = sadd.s32 4294967294, %s719_s15   ;;  %s719_s15 = sphi %s755_s15, %s1006_s15   ;;  %s715_s14 = sphi %s753_s14, %s1005_s14   ;;  %s711_s13 = sphi %s751_s13, %s1004_s13   ;;  %s707_s12 = sphi %s749_s12, %s1003_s12  }
   0x7   : > { %p40_p0 = scmp.ne.s32.totalorder %s711_s13, %s707_s12  ;;  %p987_p1 = scmp.eq.s32.totalorder %s770_s16, 0 }
   0x8   : > { %p112_p3 = scmp.eq.s32.totalorder %s430_s17, 1  ;;  %p431_p5 = scmp.ge.s32.totalorder %s719_s15, 1 }
   0x9   : > { %p779_p4 = por %p987_p1, %p40_p0  ;;  %p119_p7 = scmp.lt.s32.totalorder %s719_s15, 3 }
   0xa   : > { %p784_p6 = por %p112_p3, %p40_p0  ;;  %s721_s21 = smov [#allocation5]  }
   0xb   : > { %s990_s18 = scalar_select %p779_p4, 1, 0 }
   0xc   : > { %s991_s19 = scalar_select %p784_p6, 1, 0 }
   0xd   : > { %p789_p8 = pnand %p431_p5, %p119_p7  ;;  %s131_s22 = sshll.u32 %s721_s21, 4  ;;  %s793_s22 = int_to_ptr.vmem [resolvable:$true] %s131_s22 }
   0xe   : > { %s722_s24 = smov [#allocation7]   ;;  %s563_s28 = scalar_lea.hbm %s984_s1, 1024 }
   0xf   : > { %p496_p9 = pneg %p789_p8  ;;  %s145_s25 = sshll.u32 %s722_s24, 4  ;;  %s804_s25 = int_to_ptr.vmem [resolvable:$true] %s145_s25 }
  0x10   : > { %p564_p12 = scmp.ne.s32.totalorder %s984_s1, %s563_s28  ;;  %p570_p5 = scmp.lt.u32.totalorder %s563_s28, %s984_s1 }
  0x11   : > { %p800_p11 = pnand %p496_p9, %p987_p1 }
  0x13   : > { %p565_p13 = pneg %p800_p11 }
  0x15   : > { %p566_p0 = pnand %p565_p13, %p564_p12 }
  0x17   : > { %p567_p3 = pneg %p566_p0 }
  0x19   : > { %p572_p7 = pnand %p570_p5, %p567_p3 }
  0x1b   : > { %575 = shalt.err (!%p572_p7)
}
  0x1c   : > { %s576_s6 = scalar_lea.vmem %s793_s22, 1024  ;;  %p584_p2 = scmp.lt.s32.totalorder %s793_s22, %s793_s22 }
  0x1d   : > { %p577_p9 = scmp.ne.s32.totalorder %s793_s22, %s576_s6  ;;  %p585_p12 = scmp.lt.s32.totalorder %s576_s6, %s576_s6 }
  0x1f   : > { %p579_p10 = pnand %p577_p9, %p565_p13  ;;  %p586_p0 = por %p585_p12, %p584_p2 }
  0x21   : > { %p580_p1 = pneg %p579_p10 }
  0x23   : > { %p587_p6 = pnand %p586_p0, %p580_p1 }
  0x25   : > { %590 = shalt.err (!%p587_p6)
}
  0x26   : > { %s723_s7 = smov 64   ;;  %s724_s8 = smov 4  }
  0x27   : > { %499 = dma.hbm_to_vmem [thread:$0]  (!%p800_p11), %s984_s1, 1024, %s793_s22, [#allocation6], %s723_s7, %s723_s7, %s724_s8  }
  0x28   : > { %s591_s21 = scalar_lea.hbm %s985_s2, 16 }
  0x29   : > { %p592_p2 = scmp.ne.s32.totalorder %s985_s2, %s591_s21  ;;  %p598_p10 = scmp.lt.u32.totalorder %s591_s21, %s985_s2 }
  0x2b   : > { %p594_p1 = pnand %p592_p2, %p565_p13 }
  0x2d   : > { %p595_p6 = pneg %p594_p1 }
  0x2f   : > { %p600_p3 = pnand %p598_p10, %p595_p6 }
  0x31   : > { %603 = shalt.err (!%p600_p3)
}
  0x32   : > { %s604_s22 = scalar_lea.vmem %s804_s25, 16  ;;  %s611_s29 = scalar_lea.vmem %s804_s25, 32 }
  0x33   : > { %p605_p5 = scmp.ne.s32.totalorder %s804_s25, %s604_s22  ;;  %p612_p12 = scmp.lt.s32.totalorder %s804_s25, %s804_s25 }
  0x34   : > { %p613_p0 = scmp.lt.s32.totalorder %s611_s29, %s604_s22 }
  0x35   : > { %p607_p7 = pnand %p605_p5, %p565_p13 }
  0x36   : > { %p614_p2 = por %p613_p0, %p612_p12 }
  0x37   : > { %p608_p9 = pneg %p607_p7 }
  0x39   : > { %p615_p1 = pnand %p614_p2, %p608_p9 }
  0x3b   : > { %618 = shalt.err (!%p615_p1)
}
  0x3c   : > { %502 = dma.hbm_to_vmem [thread:$0]  (!%p800_p11), %s985_s2, 16, %s804_s25, [#allocation6]  }
  0x3d   : > { %s860_s5 = sadd.s32 1, %s719_s15   ;;  %s27_s23 = sadd.s32 1, %s715_s14 }
  0x3e   : > { %s24_s6 = ssub.s32 %s719_s15, %s860_s5  ;;  %p34_p13 = scmp.ne.s32.totalorder %s715_s14, %s711_s13 }
  0x3f   : > { %p25_p6 = scmp.eq.s32.totalorder %s24_s6, 0  ;;  %p35_p10 = scmp.eq.s32.totalorder %s719_s15, 0 }
  0x40   : > { %p994_p3 = scmp.eq.s32.totalorder %s770_s16, 1  ;;  %p513_p7 = scmp.lt.s32.totalorder %s719_s15, 2 }
  0x41   : > { %s876_s8 = scalar_select %p25_p6, %s715_s14, %s27_s23  }
  0x42   : > { %p870_p5 = por %p994_p3, %p34_p13  ;;  %p36_p9 = por %p35_p10, %p34_p13 }
  0x43   : > { %s156_s9 = sand.u32 1, %s715_s14   ;;  %s436_s25 = sshll.u32 %s719_s15, 6 }
  0x44   : > { %s995_s7 = scalar_select %p870_p5, 1, 0 }
  0x45   : > { %s435_s10 = sshll.u32 %s156_s9, 2  ;;  %s883_s21 = scalar_lea.hbm %s983_s0, %s436_s25 }
  0x46   : > { %s160_s24 = scalar_lea.vmem [#allocation2], %s435_s10  ;;  %p887_p11 = pnand %p513_p7, %p36_p9 }
  0x47   : > { %s167_s26 = sshll.u32 %s160_s24, 4  ;;  %s157_s28 = scalar_lea.sflag [#allocation3], %s156_s9  ;;  %s885_s26 = int_to_ptr.vmem [resolvable:$true] %s167_s26 }
  0x48   : > { %s619_s22 = scalar_lea.hbm %s883_s21, 64  ;;  %p621_p0 = pneg %p887_p11 }
  0x49   : > { %p620_p12 = scmp.ne.s32.totalorder %s883_s21, %s619_s22  ;;  %s624_s4 = scalar_lea.hbm %s983_s0, 128 }
  0x4a   : > { %p625_p13 = scmp.lt.u32.totalorder %s883_s21, %s983_s0  ;;  %p626_p6 = scmp.lt.u32.totalorder %s624_s4, %s619_s22 }
  0x4b   : > { %p622_p2 = pnand %p621_p0, %p620_p12  ;;  %p628_p3 = scmp.lt.u32.totalorder %s619_s22, %s883_s21 }
  0x4c   : > { %p627_p10 = por %p626_p6, %p625_p13 }
  0x4d   : > { %p623_p1 = pneg %p622_p2 }
  0x4e   : > { %p629_p7 = por %p628_p3, %p627_p10 }
  0x50   : > { %p630_p9 = pnand %p629_p7, %p623_p1 }
  0x52   : > { %633 = shalt.err (!%p630_p9)
}
  0x53   : > { %s634_s9 = scalar_lea.vmem %s885_s26, 64  ;;  %s725_s10 = smov [#allocation2]  }
  0x54   : > { %p635_p12 = scmp.ne.s32.totalorder %s885_s26, %s634_s9  ;;  %s639_s25 = sshll.u32 %s725_s10, 4  ;;  %s640_s25 = int_to_ptr.vmem [resolvable:$false] %s639_s25 }
  0x55   : > { %s641_s11 = scalar_lea.vmem %s640_s25, 128  ;;  %p642_p4 = scmp.lt.s32.totalorder %s885_s26, %s640_s25 }
  0x56   : > { %p637_p2 = pnand %p635_p12, %p621_p0  ;;  %p643_p13 = scmp.lt.s32.totalorder %s641_s11, %s634_s9 }
  0x58   : > { %p638_p5 = pneg %p637_p2  ;;  %p644_p6 = por %p643_p13, %p642_p4 }
  0x5a   : > { %p645_p10 = pnand %p644_p6, %p638_p5 }
  0x5c   : > { %648 = shalt.err (!%p645_p10)
}
  0x5d   : > { %506 = dma.hbm_to_vmem [thread:$0]  (!%p887_p11), %s883_s21, 64, %s885_s26, %s157_s28  }
  0x5e   : > { %176 = sbr.rel (%p789_p8) target bundleno = 366 (0x16e), region = 32  ;;  %s919_s17 = sand.u32 (!%p789_p8), 1, %s711_s13  }
  0x5f   : > { %s438_s24 = sshll.u32 (!%p789_p8), %s919_s17, 2  ;;  %s179_s22 = scalar_lea.sflag (!%p789_p8), [#allocation3], %s919_s17 }
  0x60   : > { %s923_s29 = scalar_lea.vmem (!%p789_p8), [#allocation2], %s438_s24  ;;  %p997_p4 = scmp.ne.s32.totalorder (!%p789_p8), %s990_s18, 0 }
  0x65   : > { %694 = dma.done.wait (%p997_p4), %s179_s22, 64  }
  0x66   : > { %696 = vsyncadd (%p997_p4), %s179_s22, 4294967232  ;;  %p998_p5 = scmp.eq.s32.totalorder %s770_s16, 0 }
  0x68   : > { %698 = dma.done.wait (%p998_p5), [#allocation6], 1040   ;;  %p999_p8 = pmov %p998_p5 }
  0x69   : > { %v726_v0 = vmov 0.0   ;;  %vm727_vm0 = vmmov 0   ;;  %v555_v1 = vld [vmem:[#allocation5] sm:$0xff]   ;;  %v556_v2 = vld [vmem:[#allocation5 + $0x8] sm:$0xff]   ;;  %v557_v3 = vld [vmem:[#allocation5 + $0x10] sm:$0xff]   ;;  %s441_s18 = sshll.u32 %s919_s17, 3 }
  0x6a   : > { %700 = vsyncadd (%p999_p8), [#allocation6], 4294966256  ;;  %464 = vmatprep.subr.bf16.mxu0 %v726_v0  ;;  %480 = vmatprep.mubr.msk.bf16.mxu0 %vm727_vm0, %v726_v0  ;;  %v558_v4 = vld [vmem:[#allocation5 + $0x18] sm:$0xff]   ;;  %v559_v5 = vld [vmem:[#allocation5 + $0x20] sm:$0xff]   ;;  %s452_s20 = sshll.u32 %s770_s16, 7  ;;  %s212_s21 = scalar_lea.vmem [#allocation8], %s441_s18 }
  0x6b   : > { %465 = vmatpush3.bf16.msra.mxu0 %v555_v1  ;;  %v560_v6 = vld [vmem:[#allocation5 + $0x28] sm:$0xff]   ;;  %v561_v7 = vld [vmem:[#allocation5 + $0x30] sm:$0xff]   ;;  %v562_v8 = vld [vmem:[#allocation5 + $0x38] sm:$0xff]   ;;  %s341_s26 = sshll.u32 %s212_s21, 4  ;;  %s939_s30 = scalar_lea.hbm %s986_s3, %s452_s20  ;;  %s941_s26 = int_to_ptr.vmem [resolvable:$true] %s341_s26 }
  0x6c   : > { %466 = vmatprep.subr.bf16.mxu0 %v726_v0  ;;  %v214_v9 = vld [vmem:[%s923_s29] sm:$0xf]  ;;  %v442_v10 = vld [vmem:[#allocation7] ss:$0 sm:$0xff]  ;;  %s328_s4 = scalar_lea.sflag [#allocation4], %s919_s17  ;;  %s649_s16 = scalar_lea.vmem %s941_s26, 128 }
  0x6d   : > { %p650_p11 = scmp.ne.s32.totalorder %s941_s26, %s649_s16  ;;  %p1000_p0 = scmp.ne.s32.totalorder %s995_s7, 0 }
  0x6e   : > { %s728_s23 = smov [#allocation8]  }
  0x6f   : > { %467 = vmatpush3.bf16.msra.mxu0 %v556_v2  ;;  %p651_p1 = pnand %p650_p11, %p1000_p0  ;;  %s653_s6 = sshll.u32 %s728_s23, 4  ;;  %s654_s6 = int_to_ptr.vmem [resolvable:$false] %s653_s6 }
  0x70   : > { %468 = vmatprep.subr.bf16.mxu0 %v726_v0  ;;  %s655_s9 = scalar_lea.vmem %s654_s6, 256  ;;  %p656_p7 = scmp.lt.s32.totalorder %s941_s26, %s654_s6 }
  0x71   : > { %p652_p3 = pneg %p651_p1  ;;  %p657_p9 = scmp.lt.s32.totalorder %s655_s9, %s649_s16 }
  0x73   : > { %469 = vmatpush3.bf16.msra.mxu0 %v557_v3  ;;  %p658_p12 = por %p657_p9, %p656_p7 }
  0x74   : > { %470 = vmatprep.subr.bf16.mxu0 %v726_v0 }
  0x75   : > { %p659_p2 = pnand %p658_p12, %p652_p3 }
  0x77   : > { %471 = vmatpush3.bf16.msra.mxu0 %v558_v4 }
  0x78   : > { %472 = vmatprep.subr.bf16.mxu0 %v726_v0 }
  0x7b   : > { %473 = vmatpush3.bf16.msra.mxu0 %v559_v5 }
  0x7c   : > { %474 = vmatprep.subr.bf16.mxu0 %v726_v0 }
  0x7f   : > { %475 = vmatpush3.bf16.msra.mxu0 %v560_v6 }
  0x80   : > { %476 = vmatprep.subr.bf16.mxu0 %v726_v0 }
  0x83   : > { %477 = vmatpush3.bf16.msra.mxu0 %v561_v7 }
  0x84   : > { %478 = vmatprep.subr.bf16.mxu0 %v726_v0 }
  0x87   : > { %479 = vmatpush3.bf16.msra.mxu0 %v562_v8 }
  0x8a   : > { %481 = vmatmul.mubr.bf16.vlgmr.msra.gmra.mrb[0].mxu0 %v214_v9 }
 0x15d   : > { %v320_v11 = vpop.f32.mrb[0].mxu0 }
 0x15e   : > { %v321_v12 = vadd.f32 %v442_v10, %v320_v11  ;;  %v482_v13 = vpop.f32.mrb[1].mxu0 }
 0x15f   : > { %v323_v14 = vpop.f32.mrb[2].mxu0 }
 0x160   : > { %326 = vst [vmem:[%s212_s21] sm:$0xff] %v321_v12  ;;  %v483_v15 = vpop.f32.mrb[3].mxu0 }
 0x161   : > { %662 = shalt.err (!%p659_p2)
}
 0x162   : > { %s663_s10 = scalar_lea.hbm %s939_s30, 128  ;;  %s667_s17 = scalar_lea.hbm %s986_s3, 256 }
 0x163   : > { %p664_p13 = scmp.ne.s32.totalorder %s939_s30, %s663_s10  ;;  %p668_p4 = scmp.lt.u32.totalorder %s939_s30, %s986_s3 }
 0x164   : > { %p669_p5 = scmp.lt.u32.totalorder %s667_s17, %s663_s10  ;;  %p671_p11 = scmp.lt.u32.totalorder %s663_s10, %s939_s30 }
 0x165   : > { %p665_p6 = pnand %p664_p13, %p1000_p0 }
 0x166   : > { %p670_p8 = por %p669_p5, %p668_p4 }
 0x167   : > { %p666_p10 = pneg %p665_p6 }
 0x168   : > { %p672_p1 = por %p671_p11, %p670_p8 }
 0x16a   : > { %p673_p3 = pnand %p672_p1, %p666_p10 }
 0x16c   : > { %676 = shalt.err (!%p673_p3)
}
 0x16d   : > { %494 = dma.vmem_to_hbm [thread:$0]  (%p1000_p0), %s941_s26, 128, %s939_s30, %s328_s4  }
 0x16e PF: > { %s353_s29 = sand.u32 1, %s707_s12   ;;  %p1001_p7 = scmp.ne.s32.totalorder %s991_s19, 0 }
 0x16f   : > { %p1002_p9 = scmp.ge.s32.totalorder %s719_s15, 2  ;;  %s354_s18 = scalar_lea.sflag [#allocation4], %s353_s29 }
 0x171   : > { %p508_p12 = pnand %p1002_p9, %p1001_p7 }
 0x173   : > { %702 = dma.done.wait (!%p508_p12), %s354_s18, 128  }
 0x174   : > { %704 = vsyncadd (!%p508_p12), %s354_s18, 4294967168  ;;  %p17_p2 = scmp.ge.s32.totalorder %s860_s5, 4   ;;  %s1003_s12 = smov %s711_s13 }
 0x175   : > { %s1004_s13 = smov %s715_s14  ;;  %s1005_s14 = smov %s876_s8 }
 0x176   : > { %s1006_s15 = smov %s860_s5  ;;  %19 = sbr.rel (!%p17_p2) target bundleno = 6 (0x6), region = 85 }
 0x17d   :  { %359 = vsyncpa [#allocation3], 1 }
 0x17e   :  { %361 = vsyncpa [#allocation3 + $0x1], 1 }
 0x17f   :  { %362 = vsyncpa [#allocation6], 1 }
 0x180   :  { %363 = vsyncpa [#allocation4], 1 }
 0x181   :  { %365 = vsyncpa [#allocation4 + $0x1], 1 }

</bundles_post_ra>
